<compile_context>
chip_gen: v6e
topology: v6e:2x2x1
jax: 0.10.0
libtpu: 0.0.40
codegen_flags: <defaults>
</compile_context>

<pallas_src>
import jax
import jax.numpy as jnp
from jax.experimental import pallas as pl
from jax.experimental.pallas import tpu as pltpu


# ---------------------------------------------------------------------------
# Fused kernel: (conv3x3 + BN + ReLU) x 2, everything resident in VMEM.
# ---------------------------------------------------------------------------
def conv_block_kernel(x_ref, wc1_ref, wc2_ref, g1_ref, be1_ref, g2_ref, be2_ref,
                      gsum_ref, bcast_ref, mtop_ref, mbot_ref, o_ref):
    R = x_ref.shape[0]                      # N*H rows
    Co = g1_ref.shape[1]                    # Cout
    Wsp = o_ref.shape[1] // Co              # spatial W
    inv_m = 1.0 / float(R * Wsp)            # 1 / (N*H*W)

    mtop = mtop_ref[...]                    # (R,1) f32: 0 where h == 0
    mbot = mbot_ref[...]                    # (R,1) f32: 0 where h == H-1
    gsum = gsum_ref[...]                    # (W*Co, Co) f32 tile-sum matrix
    bcast = bcast_ref[...]                  # (Co, W*Co) f32 broadcast matrix
    ones_r = jnp.ones((1, R), jnp.float32)

    def conv3x3(xs, wc_ref):
        # xs: (R, W*Ci) f32 slab.  kx taps + W-edge zero padding are folded
        # into wc; ky taps are sublane row offsets + image-boundary masks.
        x_dn = pltpu.roll(xs, 1, axis=0) * mtop        # reads row r-1 (ky = 0)
        x_up = pltpu.roll(xs, R - 1, axis=0) * mbot    # reads row r+1 (ky = 2)
        acc = jnp.dot(x_dn.astype(jnp.bfloat16), wc_ref[0],
                      preferred_element_type=jnp.float32)
        acc += jnp.dot(xs.astype(jnp.bfloat16), wc_ref[1],
                       preferred_element_type=jnp.float32)
        acc += jnp.dot(x_up.astype(jnp.bfloat16), wc_ref[2],
                       preferred_element_type=jnp.float32)
        return acc                                      # (R, W*Co) f32

    def bn_relu(acc, g_ref, be_ref):
        # Training-mode BN; reductions + broadcasts on the (idle) MXU,
        # two-pass variance, elementwise math in f32 on the VPU/EUP.
        mean_c = jnp.dot(
            jnp.dot(ones_r, acc, preferred_element_type=jnp.float32),
            gsum, preferred_element_type=jnp.float32) * inv_m          # (1, Co)
        centered = acc - jnp.dot(mean_c, bcast,
                                 preferred_element_type=jnp.float32)
        var_c = jnp.dot(
            jnp.dot(ones_r, centered * centered,
                    preferred_element_type=jnp.float32),
            gsum, preferred_element_type=jnp.float32) * inv_m          # (1, Co)
        scale_c = g_ref[...] * jax.lax.rsqrt(var_c + 1e-5)             # (1, Co)
        y = (centered
             * jnp.dot(scale_c, bcast, preferred_element_type=jnp.float32)
             + jnp.dot(be_ref[...], bcast, preferred_element_type=jnp.float32))
        return jnp.maximum(y, 0.0)                                      # ReLU

    # stage 1 -> stage 2; intermediate never leaves VMEM, stays lane-dense.
    h1 = bn_relu(conv3x3(x_ref[...], wc1_ref), g1_ref, be1_ref)   # (R, W*Co)
    y2 = bn_relu(conv3x3(h1, wc2_ref), g2_ref, be2_ref)           # (R, W*Co)
    o_ref[...] = y2.astype(o_ref.dtype)


# ---------------------------------------------------------------------------
# Wrapper: boundary-only layout glue + weight/mask preparation.
# ---------------------------------------------------------------------------
def _slab_weights(w_hwio, wsp):
    """Fold the 3 kx taps + W-edge zero padding into (3, W*Ci, W*Co)."""
    _, _, ci, co = w_hwio.shape
    # shifts[d][ws, w] = 1 iff ws == w + (d-1), i.e. output col w reads source
    # col w+dx; out-of-range reads simply have no weight entry (zero padding).
    shifts = jnp.stack(
        [jnp.eye(wsp, k=1 - d, dtype=jnp.float32) for d in range(3)])
    wc = jnp.einsum("dsw,kdio->ksiwo", shifts, w_hwio.astype(jnp.float32))
    return wc.reshape(3, wsp * ci, wsp * co)


def conv_block_forward(x_nchw, params):
    """Full ConvBlock forward. Takes / returns NCHW (PyTorch convention)."""
    N, Cin, H, W = x_nchw.shape
    Cout = params["w1_hwio"].shape[-1]
    R, Lin, Lout = N * H, W * Cin, W * Cout

    # NCHW -> lane-dense slab (N*H, W*Cin); interior stays in this layout.
    x_slab = jnp.transpose(x_nchw, (0, 2, 3, 1)).reshape(R, Lin).astype(jnp.float32)

    # bf16 MXU weights with kx taps / W-edge padding folded in.
    wc1 = _slab_weights(params["w1_hwio"], W).astype(jnp.bfloat16)  # (3, W*Cin, W*Cout)
    wc2 = _slab_weights(params["w2_hwio"], W).astype(jnp.bfloat16)  # (3, W*Cout, W*Cout)

    # BN helper matrices: fold the W lane-blocks to channels / broadcast back.
    gsum = jnp.tile(jnp.eye(Cout, dtype=jnp.float32), (W, 1))       # (W*Cout, Cout)
    bcast = jnp.tile(jnp.eye(Cout, dtype=jnp.float32), (1, W))      # (Cout, W*Cout)

    # Image-boundary row masks for the ky taps (rows are n*H + h).
    h_idx = jnp.arange(R, dtype=jnp.int32) % H
    mask_top = (h_idx != 0).astype(jnp.float32).reshape(R, 1)       # row r-1 valid
    mask_bot = (h_idx != H - 1).astype(jnp.float32).reshape(R, 1)   # row r+1 valid

    out_slab = pl.pallas_call(
        conv_block_kernel,
        out_shape=jax.ShapeDtypeStruct((R, Lout), jnp.float32),
        # small shapes: whole arrays resident in VMEM, no grid needed.
        in_specs=[pl.BlockSpec(memory_space=pltpu.MemorySpace.VMEM)] * 11,
        out_specs=pl.BlockSpec(memory_space=pltpu.MemorySpace.VMEM),
        compiler_params=pltpu.CompilerParams(vmem_limit_bytes=32 * 1024 * 1024),
    )(
        x_slab, wc1, wc2,
        params["g1"].reshape(1, Cout).astype(jnp.float32),
        params["beta1"].reshape(1, Cout).astype(jnp.float32),
        params["g2"].reshape(1, Cout).astype(jnp.float32),
        params["beta2"].reshape(1, Cout).astype(jnp.float32),
        gsum, bcast, mask_top, mask_bot,
    )
    # (N*H, W*Cout) -> (N,H,W,Cout) -> NCHW (boundary layout glue only).
    return jnp.transpose(out_slab.reshape(N, H, W, Cout), (0, 3, 1, 2))


# ---------------------------------------------------------------------------
# Pure-JAX reference (correctness check).  Conv operands cast to bf16 to match
# the kernel's MXU dtype; accumulation and BN stay f32.  Includes the conv
# bias: training-mode BN subtracts the per-channel mean, so the kernel (which
# omits the bias) must match exactly up to rounding.
# ---------------------------------------------------------------------------
def ref_forward(x_nchw, params):
    def conv(x, w_oihw, b):
        y = jax.lax.conv_general_dilated(
            x.astype(jnp.bfloat16), w_oihw.astype(jnp.bfloat16),
            window_strides=(1, 1), padding="SAME",
            dimension_numbers=("NCHW", "OIHW", "NCHW"),
            preferred_element_type=jnp.float32)
        return y + b[None, :, None, None]

    def bn(x, g, be):
        mean = x.mean(axis=(0, 2, 3), keepdims=True)
        var = ((x - mean) ** 2).mean(axis=(0, 2, 3), keepdims=True)
        return ((x - mean) * jax.lax.rsqrt(var + 1e-5)
                * g[None, :, None, None] + be[None, :, None, None])

    h = jax.nn.relu(bn(conv(x_nchw, params["w1_oihw"], params["b1"]),
                       params["g1"], params["beta1"]))
    h = jax.nn.relu(bn(conv(h, params["w2_oihw"], params["b2"]),
                       params["g2"], params["beta2"]))
    return h


def init_params(key, input_dim, output_dim):
    ks = jax.random.split(key, 8)
    w1_oihw = 0.1 * jax.random.normal(ks[0], (output_dim, input_dim, 3, 3), jnp.float32)
    b1 = 0.1 * jax.random.normal(ks[1], (output_dim,), jnp.float32)
    w2_oihw = 0.1 * jax.random.normal(ks[2], (output_dim, output_dim, 3, 3), jnp.float32)
    b2 = 0.1 * jax.random.normal(ks[3], (output_dim,), jnp.float32)
    return {
        "w1_oihw": w1_oihw,
        "w1_hwio": jnp.transpose(w1_oihw, (2, 3, 1, 0)),
        "b1": b1,
        # non-default BN affine so the scale/shift path is actually exercised
        "g1": 1.0 + 0.1 * jax.random.normal(ks[4], (output_dim,), jnp.float32),
        "beta1": 0.1 * jax.random.normal(ks[5], (output_dim,), jnp.float32),
        "w2_oihw": w2_oihw,
        "w2_hwio": jnp.transpose(w2_oihw, (2, 3, 1, 0)),
        "b2": b2,
        "g2": 1.0 + 0.1 * jax.random.normal(ks[6], (output_dim,), jnp.float32),
        "beta2": 0.1 * jax.random.normal(ks[7], (output_dim,), jnp.float32),
    }


if __name__ == "__main__":
    key = jax.random.PRNGKey(0)
    k_in, k_p = jax.random.split(key)

    N, Cin, Cout, HW = 2, 4, 8, 16          # W*Cout = 128 -> lane-dense slab
    x = jax.random.normal(k_in, (N, Cin, HW, HW), jnp.float32)   # NCHW
    params = init_params(k_p, Cin, Cout)

    out = jax.block_until_ready(conv_block_forward(x, params))
    assert out.shape == (N, Cout, HW, HW), out.shape

    ref = jax.block_until_ready(ref_forward(x, params))
    err = float(jnp.max(jnp.abs(out - ref)))
    # bf16 MXU operands in both kernel and reference; tolerance covers
    # accumulation-order and double-rounding differences only.
    assert err < 1e-2, f"max abs error too large: {err}"

    print("KERNEL_OK")
</pallas_src>

<mosaic_0001>
module attributes {stable_mosaic.version = 11 : i64} {
  func.func @conv_block_kernel(%arg0: memref<32x64xf32, #tpu.memory_space<vmem>>, %arg1: memref<3x64x128xbf16, #tpu.memory_space<vmem>>, %arg2: memref<3x128x128xbf16, #tpu.memory_space<vmem>>, %arg3: memref<1x8xf32, #tpu.memory_space<vmem>>, %arg4: memref<1x8xf32, #tpu.memory_space<vmem>>, %arg5: memref<1x8xf32, #tpu.memory_space<vmem>>, %arg6: memref<1x8xf32, #tpu.memory_space<vmem>>, %arg7: memref<128x8xf32, #tpu.memory_space<vmem>>, %arg8: memref<8x128xf32, #tpu.memory_space<vmem>>, %arg9: memref<32x1xf32, #tpu.memory_space<vmem>>, %arg10: memref<32x1xf32, #tpu.memory_space<vmem>>, %arg11: memref<32x128xf32, #tpu.memory_space<vmem>>) attributes {dimension_semantics = [], scalar_prefetch = 0 : i64, scratch_operands = 0 : i64, tpu.core_type = #tpu.core_type<tc>} {
    %c0 = arith.constant 0 : index
    %c0_0 = arith.constant 0 : index
    %0 = vector.load %arg9[%c0, %c0_0] : memref<32x1xf32, #tpu.memory_space<vmem>>, vector<32x1xf32>
    %c0_1 = arith.constant 0 : index
    %c0_2 = arith.constant 0 : index
    %1 = vector.load %arg10[%c0_1, %c0_2] : memref<32x1xf32, #tpu.memory_space<vmem>>, vector<32x1xf32>
    %c0_3 = arith.constant 0 : index
    %c0_4 = arith.constant 0 : index
    %2 = vector.load %arg7[%c0_3, %c0_4] : memref<128x8xf32, #tpu.memory_space<vmem>>, vector<128x8xf32>
    %c0_5 = arith.constant 0 : index
    %c0_6 = arith.constant 0 : index
    %3 = vector.load %arg8[%c0_5, %c0_6] : memref<8x128xf32, #tpu.memory_space<vmem>>, vector<8x128xf32>
    %cst = arith.constant 1.000000e+00 : f32
    %4 = vector.broadcast %cst : f32 to vector<1x32xf32>
    %c0_7 = arith.constant 0 : index
    %c0_8 = arith.constant 0 : index
    %5 = vector.load %arg0[%c0_7, %c0_8] : memref<32x64xf32, #tpu.memory_space<vmem>>, vector<32x64xf32>
    %c1_i32 = arith.constant 1 : i32
    %6 = tpu.dynamic_rotate %5 by %c1_i32 dim 0 : vector<32x64xf32>, i32 -> vector<32x64xf32>
    %7 = vector.broadcast %0 : vector<32x1xf32> to vector<32x64xf32>
    %8 = arith.mulf %6, %7 : vector<32x64xf32>
    %c31_i32 = arith.constant 31 : i32
    %9 = tpu.dynamic_rotate %5 by %c31_i32 dim 0 : vector<32x64xf32>, i32 -> vector<32x64xf32>
    %10 = vector.broadcast %1 : vector<32x1xf32> to vector<32x64xf32>
    %11 = arith.mulf %9, %10 : vector<32x64xf32>
    %12 = arith.truncf %8 : vector<32x64xf32> to vector<32x64xbf16>
    %c0_9 = arith.constant 0 : index
    %c0_10 = arith.constant 0 : index
    %c0_11 = arith.constant 0 : index
    %13 = vector.load %arg1[%c0_9, %c0_10, %c0_11] : memref<3x64x128xbf16, #tpu.memory_space<vmem>>, vector<1x64x128xbf16>
    %14 = vector.shape_cast %13 : vector<1x64x128xbf16> to vector<64x128xbf16>
    %cst_12 = arith.constant dense<0.000000e+00> : vector<32x128xf32>
    %15 = tpu.matmul %12, %14, %cst_12 {dimension_numbers = #tpu.dot_dimension_numbers<[1], [0], [0], [1], [0, 0, 1, 1], [], []>} : vector<32x64xbf16>, vector<64x128xbf16>, vector<32x128xf32> -> vector<32x128xf32>
    %16 = arith.truncf %5 : vector<32x64xf32> to vector<32x64xbf16>
    %c1 = arith.constant 1 : index
    %c0_13 = arith.constant 0 : index
    %c0_14 = arith.constant 0 : index
    %17 = vector.load %arg1[%c1, %c0_13, %c0_14] : memref<3x64x128xbf16, #tpu.memory_space<vmem>>, vector<1x64x128xbf16>
    %18 = vector.shape_cast %17 : vector<1x64x128xbf16> to vector<64x128xbf16>
    %cst_15 = arith.constant dense<0.000000e+00> : vector<32x128xf32>
    %19 = tpu.matmul %16, %18, %cst_15 {dimension_numbers = #tpu.dot_dimension_numbers<[1], [0], [0], [1], [0, 0, 1, 1], [], []>} : vector<32x64xbf16>, vector<64x128xbf16>, vector<32x128xf32> -> vector<32x128xf32>
    %20 = arith.addf %15, %19 : vector<32x128xf32>
    %21 = arith.truncf %11 : vector<32x64xf32> to vector<32x64xbf16>
    %c2 = arith.constant 2 : index
    %c0_16 = arith.constant 0 : index
    %c0_17 = arith.constant 0 : index
    %22 = vector.load %arg1[%c2, %c0_16, %c0_17] : memref<3x64x128xbf16, #tpu.memory_space<vmem>>, vector<1x64x128xbf16>
    %23 = vector.shape_cast %22 : vector<1x64x128xbf16> to vector<64x128xbf16>
    %cst_18 = arith.constant dense<0.000000e+00> : vector<32x128xf32>
    %24 = tpu.matmul %21, %23, %cst_18 {dimension_numbers = #tpu.dot_dimension_numbers<[1], [0], [0], [1], [0, 0, 1, 1], [], []>} : vector<32x64xbf16>, vector<64x128xbf16>, vector<32x128xf32> -> vector<32x128xf32>
    %25 = arith.addf %20, %24 : vector<32x128xf32>
    %cst_19 = arith.constant dense<0.000000e+00> : vector<1x128xf32>
    %26 = tpu.matmul %4, %25, %cst_19 {dimension_numbers = #tpu.dot_dimension_numbers<[1], [0], [0], [1], [0, 0, 1, 1], [], []>} : vector<1x32xf32>, vector<32x128xf32>, vector<1x128xf32> -> vector<1x128xf32>
    %cst_20 = arith.constant dense<0.000000e+00> : vector<1x8xf32>
    %27 = tpu.matmul %26, %2, %cst_20 {dimension_numbers = #tpu.dot_dimension_numbers<[1], [0], [0], [1], [0, 0, 1, 1], [], []>} : vector<1x128xf32>, vector<128x8xf32>, vector<1x8xf32> -> vector<1x8xf32>
    %cst_21 = arith.constant 0.001953125 : f32
    %28 = vector.broadcast %cst_21 : f32 to vector<1x8xf32>
    %29 = arith.mulf %27, %28 : vector<1x8xf32>
    %cst_22 = arith.constant dense<0.000000e+00> : vector<1x128xf32>
    %30 = tpu.matmul %29, %3, %cst_22 {dimension_numbers = #tpu.dot_dimension_numbers<[1], [0], [0], [1], [0, 0, 1, 1], [], []>} : vector<1x8xf32>, vector<8x128xf32>, vector<1x128xf32> -> vector<1x128xf32>
    %31 = vector.broadcast %30 : vector<1x128xf32> to vector<32x128xf32>
    %32 = arith.subf %25, %31 : vector<32x128xf32>
    %33 = arith.mulf %32, %32 : vector<32x128xf32>
    %cst_23 = arith.constant dense<0.000000e+00> : vector<1x128xf32>
    %34 = tpu.matmul %4, %33, %cst_23 {dimension_numbers = #tpu.dot_dimension_numbers<[1], [0], [0], [1], [0, 0, 1, 1], [], []>} : vector<1x32xf32>, vector<32x128xf32>, vector<1x128xf32> -> vector<1x128xf32>
    %cst_24 = arith.constant dense<0.000000e+00> : vector<1x8xf32>
    %35 = tpu.matmul %34, %2, %cst_24 {dimension_numbers = #tpu.dot_dimension_numbers<[1], [0], [0], [1], [0, 0, 1, 1], [], []>} : vector<1x128xf32>, vector<128x8xf32>, vector<1x8xf32> -> vector<1x8xf32>
    %cst_25 = arith.constant 0.001953125 : f32
    %36 = vector.broadcast %cst_25 : f32 to vector<1x8xf32>
    %37 = arith.mulf %35, %36 : vector<1x8xf32>
    %c0_26 = arith.constant 0 : index
    %c0_27 = arith.constant 0 : index
    %38 = vector.load %arg3[%c0_26, %c0_27] : memref<1x8xf32, #tpu.memory_space<vmem>>, vector<1x8xf32>
    %cst_28 = arith.constant 9.99999974E-6 : f32
    %39 = vector.broadcast %cst_28 : f32 to vector<1x8xf32>
    %40 = arith.addf %37, %39 : vector<1x8xf32>
    %41 = math.rsqrt %40 : vector<1x8xf32>
    %42 = arith.mulf %38, %41 : vector<1x8xf32>
    %cst_29 = arith.constant dense<0.000000e+00> : vector<1x128xf32>
    %43 = tpu.matmul %42, %3, %cst_29 {dimension_numbers = #tpu.dot_dimension_numbers<[1], [0], [0], [1], [0, 0, 1, 1], [], []>} : vector<1x8xf32>, vector<8x128xf32>, vector<1x128xf32> -> vector<1x128xf32>
    %44 = vector.broadcast %43 : vector<1x128xf32> to vector<32x128xf32>
    %45 = arith.mulf %32, %44 : vector<32x128xf32>
    %c0_30 = arith.constant 0 : index
    %c0_31 = arith.constant 0 : index
    %46 = vector.load %arg4[%c0_30, %c0_31] : memref<1x8xf32, #tpu.memory_space<vmem>>, vector<1x8xf32>
    %cst_32 = arith.constant dense<0.000000e+00> : vector<1x128xf32>
    %47 = tpu.matmul %46, %3, %cst_32 {dimension_numbers = #tpu.dot_dimension_numbers<[1], [0], [0], [1], [0, 0, 1, 1], [], []>} : vector<1x8xf32>, vector<8x128xf32>, vector<1x128xf32> -> vector<1x128xf32>
    %48 = vector.broadcast %47 : vector<1x128xf32> to vector<32x128xf32>
    %49 = arith.addf %45, %48 : vector<32x128xf32>
    %cst_33 = arith.constant 0.000000e+00 : f32
    %50 = vector.broadcast %cst_33 : f32 to vector<32x128xf32>
    %51 = arith.maximumf %49, %50 : vector<32x128xf32>
    %c1_i32_34 = arith.constant 1 : i32
    %52 = tpu.dynamic_rotate %51 by %c1_i32_34 dim 0 : vector<32x128xf32>, i32 -> vector<32x128xf32>
    %53 = vector.broadcast %0 : vector<32x1xf32> to vector<32x128xf32>
    %54 = arith.mulf %52, %53 : vector<32x128xf32>
    %c31_i32_35 = arith.constant 31 : i32
    %55 = tpu.dynamic_rotate %51 by %c31_i32_35 dim 0 : vector<32x128xf32>, i32 -> vector<32x128xf32>
    %56 = vector.broadcast %1 : vector<32x1xf32> to vector<32x128xf32>
    %57 = arith.mulf %55, %56 : vector<32x128xf32>
    %58 = arith.truncf %54 : vector<32x128xf32> to vector<32x128xbf16>
    %c0_36 = arith.constant 0 : index
    %c0_37 = arith.constant 0 : index
    %c0_38 = arith.constant 0 : index
    %59 = vector.load %arg2[%c0_36, %c0_37, %c0_38] : memref<3x128x128xbf16, #tpu.memory_space<vmem>>, vector<1x128x128xbf16>
    %60 = vector.shape_cast %59 : vector<1x128x128xbf16> to vector<128x128xbf16>
    %cst_39 = arith.constant dense<0.000000e+00> : vector<32x128xf32>
    %61 = tpu.matmul %58, %60, %cst_39 {dimension_numbers = #tpu.dot_dimension_numbers<[1], [0], [0], [1], [0, 0, 1, 1], [], []>} : vector<32x128xbf16>, vector<128x128xbf16>, vector<32x128xf32> -> vector<32x128xf32>
    %62 = arith.truncf %51 : vector<32x128xf32> to vector<32x128xbf16>
    %c1_40 = arith.constant 1 : index
    %c0_41 = arith.constant 0 : index
    %c0_42 = arith.constant 0 : index
    %63 = vector.load %arg2[%c1_40, %c0_41, %c0_42] : memref<3x128x128xbf16, #tpu.memory_space<vmem>>, vector<1x128x128xbf16>
    %64 = vector.shape_cast %63 : vector<1x128x128xbf16> to vector<128x128xbf16>
    %cst_43 = arith.constant dense<0.000000e+00> : vector<32x128xf32>
    %65 = tpu.matmul %62, %64, %cst_43 {dimension_numbers = #tpu.dot_dimension_numbers<[1], [0], [0], [1], [0, 0, 1, 1], [], []>} : vector<32x128xbf16>, vector<128x128xbf16>, vector<32x128xf32> -> vector<32x128xf32>
    %66 = arith.addf %61, %65 : vector<32x128xf32>
    %67 = arith.truncf %57 : vector<32x128xf32> to vector<32x128xbf16>
    %c2_44 = arith.constant 2 : index
    %c0_45 = arith.constant 0 : index
    %c0_46 = arith.constant 0 : index
    %68 = vector.load %arg2[%c2_44, %c0_45, %c0_46] : memref<3x128x128xbf16, #tpu.memory_space<vmem>>, vector<1x128x128xbf16>
    %69 = vector.shape_cast %68 : vector<1x128x128xbf16> to vector<128x128xbf16>
    %cst_47 = arith.constant dense<0.000000e+00> : vector<32x128xf32>
    %70 = tpu.matmul %67, %69, %cst_47 {dimension_numbers = #tpu.dot_dimension_numbers<[1], [0], [0], [1], [0, 0, 1, 1], [], []>} : vector<32x128xbf16>, vector<128x128xbf16>, vector<32x128xf32> -> vector<32x128xf32>
    %71 = arith.addf %66, %70 : vector<32x128xf32>
    %cst_48 = arith.constant dense<0.000000e+00> : vector<1x128xf32>
    %72 = tpu.matmul %4, %71, %cst_48 {dimension_numbers = #tpu.dot_dimension_numbers<[1], [0], [0], [1], [0, 0, 1, 1], [], []>} : vector<1x32xf32>, vector<32x128xf32>, vector<1x128xf32> -> vector<1x128xf32>
    %cst_49 = arith.constant dense<0.000000e+00> : vector<1x8xf32>
    %73 = tpu.matmul %72, %2, %cst_49 {dimension_numbers = #tpu.dot_dimension_numbers<[1], [0], [0], [1], [0, 0, 1, 1], [], []>} : vector<1x128xf32>, vector<128x8xf32>, vector<1x8xf32> -> vector<1x8xf32>
    %cst_50 = arith.constant 0.001953125 : f32
    %74 = vector.broadcast %cst_50 : f32 to vector<1x8xf32>
    %75 = arith.mulf %73, %74 : vector<1x8xf32>
    %cst_51 = arith.constant dense<0.000000e+00> : vector<1x128xf32>
    %76 = tpu.matmul %75, %3, %cst_51 {dimension_numbers = #tpu.dot_dimension_numbers<[1], [0], [0], [1], [0, 0, 1, 1], [], []>} : vector<1x8xf32>, vector<8x128xf32>, vector<1x128xf32> -> vector<1x128xf32>
    %77 = vector.broadcast %76 : vector<1x128xf32> to vector<32x128xf32>
    %78 = arith.subf %71, %77 : vector<32x128xf32>
    %79 = arith.mulf %78, %78 : vector<32x128xf32>
    %cst_52 = arith.constant dense<0.000000e+00> : vector<1x128xf32>
    %80 = tpu.matmul %4, %79, %cst_52 {dimension_numbers = #tpu.dot_dimension_numbers<[1], [0], [0], [1], [0, 0, 1, 1], [], []>} : vector<1x32xf32>, vector<32x128xf32>, vector<1x128xf32> -> vector<1x128xf32>
    %cst_53 = arith.constant dense<0.000000e+00> : vector<1x8xf32>
    %81 = tpu.matmul %80, %2, %cst_53 {dimension_numbers = #tpu.dot_dimension_numbers<[1], [0], [0], [1], [0, 0, 1, 1], [], []>} : vector<1x128xf32>, vector<128x8xf32>, vector<1x8xf32> -> vector<1x8xf32>
    %cst_54 = arith.constant 0.001953125 : f32
    %82 = vector.broadcast %cst_54 : f32 to vector<1x8xf32>
    %83 = arith.mulf %81, %82 : vector<1x8xf32>
    %c0_55 = arith.constant 0 : index
    %c0_56 = arith.constant 0 : index
    %84 = vector.load %arg5[%c0_55, %c0_56] : memref<1x8xf32, #tpu.memory_space<vmem>>, vector<1x8xf32>
    %cst_57 = arith.constant 9.99999974E-6 : f32
    %85 = vector.broadcast %cst_57 : f32 to vector<1x8xf32>
    %86 = arith.addf %83, %85 : vector<1x8xf32>
    %87 = math.rsqrt %86 : vector<1x8xf32>
    %88 = arith.mulf %84, %87 : vector<1x8xf32>
    %cst_58 = arith.constant dense<0.000000e+00> : vector<1x128xf32>
    %89 = tpu.matmul %88, %3, %cst_58 {dimension_numbers = #tpu.dot_dimension_numbers<[1], [0], [0], [1], [0, 0, 1, 1], [], []>} : vector<1x8xf32>, vector<8x128xf32>, vector<1x128xf32> -> vector<1x128xf32>
    %90 = vector.broadcast %89 : vector<1x128xf32> to vector<32x128xf32>
    %91 = arith.mulf %78, %90 : vector<32x128xf32>
    %c0_59 = arith.constant 0 : index
    %c0_60 = arith.constant 0 : index
    %92 = vector.load %arg6[%c0_59, %c0_60] : memref<1x8xf32, #tpu.memory_space<vmem>>, vector<1x8xf32>
    %cst_61 = arith.constant dense<0.000000e+00> : vector<1x128xf32>
    %93 = tpu.matmul %92, %3, %cst_61 {dimension_numbers = #tpu.dot_dimension_numbers<[1], [0], [0], [1], [0, 0, 1, 1], [], []>} : vector<1x8xf32>, vector<8x128xf32>, vector<1x128xf32> -> vector<1x128xf32>
    %94 = vector.broadcast %93 : vector<1x128xf32> to vector<32x128xf32>
    %95 = arith.addf %91, %94 : vector<32x128xf32>
    %cst_62 = arith.constant 0.000000e+00 : f32
    %96 = vector.broadcast %cst_62 : f32 to vector<32x128xf32>
    %97 = arith.maximumf %95, %96 : vector<32x128xf32>
    %c0_63 = arith.constant 0 : index
    %c0_64 = arith.constant 0 : index
    %98 = vector.load %arg11[%c0_63, %c0_64] : memref<32x128xf32, #tpu.memory_space<vmem>>, vector<32x128xf32>
    tpu.vector_store %arg11[%c0_63, %c0_64], %97 {strides = array<i32>} : memref<32x128xf32, #tpu.memory_space<vmem>>, vector<32x128xf32>,
    return
  }
}

</mosaic_0001>

<bundles_post_ra>
// kernel: tpu_custom_call.1
= control target key start
LH: loop header
LB: loop body
LE: loop exit
PB: predicated region body
PF: predicated region fallthrough
CT: control target
= control target key end

     0   :  { %16 = vsyncpa [#allocation3], 0  ;;  %s3252_s0 = inlined_call_operand.hbm [shape: f32[32,64], index: 0, kind: input, shape index: {}]   ;;  %s3253_s1 = inlined_call_operand.hbm [shape: bf16[3,64,128], index: 1, kind: input, shape index: {}]   ;;  %s3254_s2 = inlined_call_operand.vmem [shape: bf16[3,128,128], index: 2, kind: input, shape index: {}]   ;;  %s3255_s3 = inlined_call_operand.vmem [shape: f32[1,8], index: 3, kind: input, shape index: {}]   ;;  %s3256_s4 = inlined_call_operand.hbm [shape: f32[1,8], index: 4, kind: input, shape index: {}]   ;;  %s3257_s5 = inlined_call_operand.hbm [shape: f32[1,8], index: 5, kind: input, shape index: {}]   ;;  %s3258_s6 = inlined_call_operand.vmem [shape: f32[1,8], index: 6, kind: input, shape index: {}]   ;;  %s3259_s7 = inlined_call_operand.vmem [shape: f32[128,8], index: 7, kind: input, shape index: {}]   ;;  %s3260_s8 = inlined_call_operand.vmem [shape: f32[8,128], index: 8, kind: input, shape index: {}]   ;;  %s3261_s9 = inlined_call_operand.vmem [shape: f32[32,1], index: 9, kind: input, shape index: {}]   ;;  %s3262_s10 = inlined_call_operand.vmem [shape: f32[32,1], index: 10, kind: input, shape index: {}]   ;;  %s3263_s11 = inlined_call_operand.hbm [shape: f32[32,128], index: 11, kind: output, shape index: {}]  }
   0x1   :  { %17 = vsyncpa [#allocation6], 0 }
   0x2   :  { %18 = vsyncpa [#allocation9], 0 }
   0x3   :  { %19 = vsyncpa [#allocation4], 0  ;;  %s2646_s17 = smov [#allocation5]  }
   0x4   :  { %s37_s18 = sshll.u32 %s2646_s17, 4  ;;  %s38_s18 = int_to_ptr.vmem [resolvable:$true] %s37_s18 }
   0x5   :  { %s2546_s19 = scalar_lea.vmem %s38_s18, 1536  ;;  %p2551_p1 = scmp.lt.s32.totalorder %s38_s18, %s38_s18 }
   0x6   :  { %p2547_p0 = scmp.ne.s32.totalorder %s38_s18, %s2546_s19  ;;  %p2552_p2 = scmp.lt.s32.totalorder %s2546_s19, %s2546_s19 }
   0x8   :  { %p2553_p3 = por %p2552_p2, %p2551_p1 }
   0xa   :  { %p2554_p4 = pnand %p2553_p3, %p2547_p0 }
   0xc   :  { %2557 = shalt.err (!%p2554_p4)
}
   0xd   :  { %s2647_s20 = smov 64   ;;  %s2648_s21 = smov 4  }
   0xe   :  { %43 = dma.hbm_to_vmem [thread:$0]  %s3253_s1, 1536, %s38_s18, [#allocation6], %s2647_s20, %s2647_s20, %s2648_s21  }
   0xf   :  { %s2649_s24 = smov [#allocation2]  }
  0x10   :  { %s25_s25 = sshll.u32 %s2649_s24, 4  ;;  %s26_s25 = int_to_ptr.vmem [resolvable:$true] %s25_s25 }
  0x11   :  { %s2566_s26 = scalar_lea.vmem %s26_s25, 512  ;;  %p2571_p6 = scmp.lt.s32.totalorder %s26_s25, %s26_s25 }
  0x12   :  { %p2567_p5 = scmp.ne.s32.totalorder %s26_s25, %s2566_s26  ;;  %p2572_p7 = scmp.lt.s32.totalorder %s2566_s26, %s2566_s26 }
  0x14   :  { %p2573_p8 = por %p2572_p7, %p2571_p6 }
  0x16   :  { %p2574_p9 = pnand %p2573_p8, %p2567_p5 }
  0x18   :  { %2577 = shalt.err (!%p2574_p9)
}
  0x19   :  { %s2650_s27 = smov 128   ;;  %s2651_s28 = smov 8  }
  0x1a   :  { %31 = dma.hbm_to_vmem [thread:$0]  %s3252_s0, 512, %s26_s25, [#allocation3], %s2650_s27, %s2650_s27, %s2651_s28  }
  0x1b   :  { %s2652_s1 = smov [#allocation7]   ;;  %s2653_s13 = smov [#allocation8]  }
  0x1c   :  { %s54_s12 = sshll.u32 %s2652_s1, 4  ;;  %s64_s14 = sshll.u32 %s2653_s13, 4  ;;  %s55_s12 = int_to_ptr.vmem [resolvable:$true] %s54_s12  ;;  %s65_s14 = int_to_ptr.vmem [resolvable:$true] %s64_s14 }
  0x1d   :  { %s2586_s15 = scalar_lea.vmem %s55_s12, 16  ;;  %s2590_s16 = scalar_lea.vmem %s55_s12, 32 }
  0x1e   :  { %p2587_p10 = scmp.ne.s32.totalorder %s55_s12, %s2586_s15  ;;  %p2591_p11 = scmp.lt.s32.totalorder %s55_s12, %s55_s12 }
  0x1f   :  { %p2592_p12 = scmp.lt.s32.totalorder %s2590_s16, %s2586_s15 }
  0x21   :  { %p2593_p13 = por %p2592_p12, %p2591_p11 }
  0x23   :  { %p2594_p0 = pnand %p2593_p13, %p2587_p10 }
  0x25   :  { %2597 = shalt.err (!%p2594_p0)
}
  0x26   :  { %57 = dma.hbm_to_vmem [thread:$0]  %s3256_s4, 16, %s55_s12, [#allocation6]  }
  0x27   :  { %s2606_s19 = scalar_lea.vmem %s65_s14, 16  ;;  %s2610_s0 = scalar_lea.vmem %s65_s14, 32 }
  0x28   :  { %p2607_p1 = scmp.ne.s32.totalorder %s65_s14, %s2606_s19  ;;  %p2611_p2 = scmp.lt.s32.totalorder %s65_s14, %s65_s14 }
  0x29   :  { %p2612_p3 = scmp.lt.s32.totalorder %s2610_s0, %s2606_s19 }
  0x2b   :  { %p2613_p4 = por %p2612_p3, %p2611_p2 }
  0x2d   :  { %p2614_p5 = pnand %p2613_p4, %p2607_p1 }
  0x2f   :  { %2617 = shalt.err (!%p2614_p5)
}
  0x30   :  { %67 = dma.hbm_to_vmem [thread:$0]  %s3257_s5, 16, %s65_s14, [#allocation9]  }
  0x31   :  { %2638 = dma.done.wait [#allocation3], 512  }
  0x32   :  { %2639 = vsyncadd [#allocation3], 4294966784 }
  0x33   :  { %2640 = dma.done.wait [#allocation6], 1552  }
  0x34   :  { %2641 = vsyncadd [#allocation6], 4294965744 }
  0x35   :  { %2642 = dma.done.wait [#allocation9], 16  }
  0x36   :  { %2643 = vsyncadd [#allocation9], 4294967280  ;;  %v2654_v0 = vmov 0   ;;  %v124_v1 = vlaneseq  ;;  %v93_v2 = vld [vmem:[%s3261_s9 + $0x10] sm:$0xff]  ;;  %v91_v3 = vld [vmem:[%s3261_s9] sm:$0xff]  ;;  %vm233_vm0 = vcmask 523264  }
  0x37   :  { %2497 = vset.pattern.permute.xlu1 %v2654_v0  ;;  %2496 = vset.pattern.permute.xlu0 %v2654_v0  ;;  %v94_v4 = vld [vmem:[%s3261_s9 + $0x18] sm:$0xff]  ;;  %v92_v5 = vld [vmem:[%s3261_s9 + $0x8] sm:$0xff]  ;;  %v2499_v9 = vld [vmem:[#allocation5 + $0x30] sm:$0xff]   ;;  %vm2656_vm3 = vmmov 0   ;;  %vm462_vm4 = vcmask 261120   ;;  %vm607_vm5 = vcmask 64512  }
  0x38   :  { %143 = vperm.xlu1 %2497, %v93_v2   ;;  %133 = vperm.xlu0 %2496, %v91_v3   ;;  %v2498_v6 = vld [vmem:[#allocation5 + $0x38] sm:$0xff]   ;;  %v2746_v7 = vshrl.u32 %v124_v1, 7  ;;  %v96_v8 = vld [vmem:[%s3262_s10 + $0x8] sm:$0xff]  ;;  %v95_v10 = vld [vmem:[%s3262_s10] sm:$0xff]  ;;  %v2655_v1 = vmov 0.0   ;;  %s2658_s24 = smov [#allocation10]  }
  0x39   :  { %2173 = vmatprep.subr.bf16.mxu0 %v2498_v6  ;;  %v2500_v11 = vld [vmem:[#allocation5 + $0x28] sm:$0xff]   ;;  %v2502_v12 = vld [vmem:[#allocation5 + $0x18] sm:$0xff]   ;;  %v116_v13 = vld [vmem:[#allocation2] sm:$0xff] }
  0x3a   :  { %2174 = vmatpush3.bf16.msra.mxu0 %v2498_v6  ;;  %vm126_vm1 = vcmp.lt.s32.totalorder %v2746_v7, 1  ;;  %v98_v14 = vld [vmem:[%s3262_s10 + $0x18] sm:$0xff]  ;;  %v117_v15 = vld [vmem:[#allocation2 + $0x8] sm:$0xff]  ;;  %v120_v16 = vrot.slane %v116_v13, 7  ;;  %v155_v17 = vrot.slane %v116_v13, 1  ;;  %v118_v18 = vld [vmem:[#allocation2 + $0x10] sm:$0xff]  ;;  %2185 = vmatprep.subr.bf16.mxu1 %v2502_v12 }
  0x3b   :  { %2175 = vmatprep.subr.bf16.mxu0 %v2499_v9  ;;  %v119_v19 = vld [vmem:[#allocation2 + $0x18] sm:$0xff]  ;;  %vm159_vm2 = vcmp.lt.s32.totalorder %v2746_v7, 7  ;;  %v121_v20 = vrot.slane %v117_v15, 7  ;;  %v156_v21 = vrot.slane %v117_v15, 1  ;;  %v198_v22 = vpack.c.bf16 %v117_v15, %v116_v13  ;;  %v97_v23 = vld [vmem:[%s3262_s10 + $0x10] sm:$0xff]  ;;  %v2501_v29 = vld [vmem:[#allocation5 + $0x20] sm:$0xff]   ;;  %2186 = vmatpush3.bf16.msra.mxu1 %v2502_v12 }
  0x3c   :  { %148 = vperm.xlu1 %2497, %v94_v4   ;;  %138 = vperm.xlu0 %2496, %v92_v5   ;;  %v2503_v24 = vld [vmem:[#allocation5 + $0x10] sm:$0xff]   ;;  %v122_v25 = vrot.slane %v118_v18, 7  ;;  %v123_v26 = vrot.slane %v119_v19, 7  ;;  %v157_v33 = vrot.slane %v118_v18, 1  ;;  %v2505_v34 = vld [vmem:[#allocation5 + $0x8] sm:$0xff]   ;;  %v158_v35 = vrot.slane %v119_v19, 1 }
  0x3d   :  { %2181 = vmatprep.mubr.msk.bf16.mxu0 %vm233_vm0, %v198_v22  ;;  %v129_v27 = vsel %vm126_vm1, %v120_v16, %v121_v20  ;;  %v162_v28 = vsel %vm159_vm2, %v155_v17, %v156_v21  ;;  %2187 = vmatprep.subr.bf16.mxu1 %v2503_v24  ;;  %v2504_v37 = vld [vmem:[#allocation5 + $0x58] sm:$0xff]   ;;  %v2507_v40 = vld [vmem:[#allocation5] sm:$0xff]   ;;  %v199_v41 = vpack.c.bf16 %v119_v19, %v118_v18  ;;  %v2506_v42 = vld [vmem:[#allocation5 + $0x50] sm:$0xff]  }
  0x3e   :  { %2176 = vmatpush3.bf16.msra.mxu0 %v2499_v9  ;;  %v128_v30 = vsel %vm126_vm1, %v121_v20, %v122_v25  ;;  %v130_v31 = vsel %vm126_vm1, %v123_v26, %v120_v16  ;;  %v127_v32 = vsel %vm126_vm1, %v122_v25, %v123_v26  ;;  %v161_v36 = vsel %vm159_vm2, %v156_v21, %v157_v33  ;;  %v2508_v43 = vld [vmem:[#allocation5 + $0x48] sm:$0xff]   ;;  %v2509_v44 = vld [vmem:[#allocation5 + $0x40] sm:$0xff]   ;;  %v2817_v2 = vld [vmem:[%s3259_s7 + $0x78] sm:$0xff] }
  0x3f   :  { %2177 = vmatprep.subr.bf16.mxu0 %v2500_v11  ;;  %v163_v38 = vsel %vm159_vm2, %v158_v35, %v155_v17  ;;  %v160_v39 = vsel %vm159_vm2, %v157_v33, %v158_v35  ;;  %2188 = vmatpush3.bf16.msra.mxu1 %v2503_v24  ;;  %v2822_v3 = vld [vmem:[%s3259_s7 + $0x70] sm:$0xff]  ;;  %v2829_v4 = vld [vmem:[%s3259_s7 + $0x68] sm:$0xff]  ;;  %v2836_v5 = vld [vmem:[%s3259_s7 + $0x60] sm:$0xff] }
  0x40   :  { %171 = vperm.xlu1 %2497, %v96_v8   ;;  %166 = vperm.xlu0 %2496, %v95_v10   ;;  %v2843_v6 = vld [vmem:[%s3259_s7 + $0x58] sm:$0xff]  ;;  %v2850_v8 = vld [vmem:[%s3259_s7 + $0x50] sm:$0xff]  ;;  %v2857_v9 = vld [vmem:[%s3259_s7 + $0x48] sm:$0xff] }
  0x41   :  { %2189 = vmatprep.subr.bf16.mxu1 %v2505_v34  ;;  %v2864_v10 = vld [vmem:[%s3259_s7 + $0x40] sm:$0xff]  ;;  %v2878_v12 = vld [vmem:[%s3259_s7 + $0x30] sm:$0xff]  ;;  %v2885_v13 = vld [vmem:[%s3259_s7 + $0x28] sm:$0xff] }
  0x42   :  { %2178 = vmatpush3.bf16.msra.mxu0 %v2500_v11  ;;  %v2871_v11 = vld [vmem:[%s3259_s7 + $0x38] sm:$0xff]  ;;  %v2906_v16 = vld [vmem:[%s3259_s7 + $0x10] sm:$0xff]  ;;  %v2913_v17 = vld [vmem:[%s3259_s7 + $0x8] sm:$0xff] }
  0x43   :  { %2179 = vmatprep.subr.bf16.mxu0 %v2501_v29  ;;  %2190 = vmatpush3.bf16.msra.mxu1 %v2505_v34  ;;  %v2899_v15 = vld [vmem:[%s3259_s7 + $0x18] sm:$0xff] }
  0x44   :  { %181 = vperm.xlu1 %2497, %v98_v14   ;;  %176 = vperm.xlu0 %2496, %v97_v23   ;;  %v2892_v14 = vld [vmem:[%s3259_s7 + $0x20] sm:$0xff] }
  0x45   :  { %2191 = vmatprep.subr.bf16.mxu1 %v2507_v40 }
  0x46   :  { %2180 = vmatpush3.bf16.msra.mxu0 %v2501_v29 }
  0x47   :  { %2197 = vmatprep.subr.bf16.mxu0 %v2504_v37  ;;  %2192 = vmatpush3.bf16.msra.mxu1 %v2507_v40 }
  0x48   :  { %2220 = vmatprep.subr.mxu1 %v2655_v1 }
  0x49   :  { %2182 = vmatmul.mubr.msk.bf16.vlgmr.msra.gmra.mxu0 %vm233_vm0, %v199_v41 }
  0x4a   :  { %2198 = vmatpush3.bf16.msra.mxu0 %v2504_v37 }
  0x4b   :  { %2199 = vmatprep.subr.bf16.mxu0 %v2506_v42 }
  0x4e   :  { %2200 = vmatpush3.bf16.msra.mxu0 %v2506_v42  ;;  %v2939_v42 = vld [vmem:[%s3260_s8] sm:$0xff] }
  0x4f   :  { %2201 = vmatprep.subr.bf16.mxu0 %v2508_v43 }
  0x52   :  { %2202 = vmatpush3.bf16.msra.mxu0 %v2508_v43 }
  0x53   :  { %2203 = vmatprep.subr.bf16.mxu0 %v2509_v44 }
  0x56   :  { %2204 = vmatpush3.bf16.msra.mxu0 %v2509_v44 }
  0x57   :  { %2209 = vmatprep.subr.mxu0 %v2655_v1 }
  0xb3   :  { %v2780_v45 = vpop.permute.xlu1 %143  ;;  %v2782_v46 = vpop.permute.xlu0 %133 }
  0xb4   :  { %v153_v49 = vmul.f32 %v2780_v45, %v128_v30  ;;  %v151_v50 = vmul.f32 %v2782_v46, %v130_v31 }
  0xb7   :  { %v2784_v47 = vpop.permute.xlu1 %148  ;;  %v2786_v48 = vpop.permute.xlu0 %138 }
  0xb8   :  { %v154_v51 = vmul.f32 %v2784_v47, %v127_v32  ;;  %v152_v52 = vmul.f32 %v2786_v48, %v129_v27 }
  0xba   :  { %v189_v53 = vpack.c.bf16 %v154_v51, %v153_v49  ;;  %v188_v54 = vpack.c.bf16 %v152_v52, %v151_v50  ;;  %v2949_v50 = vsub.s32 0, %v2746_v7 }
  0xbb   :  { %v2792_v55 = vpop.permute.xlu1 %171  ;;  %v2794_v56 = vpop.permute.xlu0 %166 }
  0xbc   :  { %v185_v57 = vmul.f32 %v2792_v55, %v161_v36  ;;  %v184_v58 = vmul.f32 %v2794_v56, %v162_v28  ;;  %2193 = vmatprep.mubr.msk.bf16.mxu1 %vm233_vm0, %v188_v54 }
  0xbd   :  { %2194 = vmatmul.mubr.msk.bf16.vlgmr.msra.gmra.mxu1 %vm233_vm0, %v189_v53 }
  0xbe   :  { %v368_v59 = vpack.c.bf16 %v185_v57, %v184_v58  ;;  %2252 = vmatprep.mubr.msk.f32.mxu1 %vm2656_vm3, %v2655_v1  ;;  %2221 = vmatpush3.msra.mxu1 %v2817_v2 }
  0xbf   :  { %v2800_v60 = vpop.permute.xlu1 %181  ;;  %v2802_v61 = vpop.permute.xlu0 %176  ;;  %2222 = vmatprep.subr.mxu1 %v2655_v1 }
  0xc0   :  { %v187_v62 = vmul.f32 %v2800_v60, %v163_v38  ;;  %v186_v63 = vmul.f32 %v2802_v61, %v160_v39  ;;  %2205 = vmatprep.mubr.msk.bf16.mxu0 %vm233_vm0, %v368_v59  ;;  %2223 = vmatpush3.msra.mxu1 %v2822_v3  ;;  %v2657_v38 = vmov 1.0   ;;  %v2930_v39 = vld [vmem:[%s3259_s7] sm:$0xff] }
  0xc1   :  { %2224 = vmatprep.subr.mxu1 %v2655_v1 }
  0xc2   :  { %v369_v0 = vpack.c.bf16 %v187_v62, %v186_v63  ;;  %2225 = vmatpush3.msra.mxu1 %v2829_v4 }
  0xc3   :  { %2226 = vmatprep.subr.mxu1 %v2655_v1 }
  0xc4   :  { %2206 = vmatmul.mubr.msk.bf16.vlgmr.msra.gmra.mxu0 %vm233_vm0, %v369_v0  ;;  %2227 = vmatpush3.msra.mxu1 %v2836_v5 }
  0xc5   :  { %2217 = vmatprep.mubr.msk.f32.mxu0 %vm2656_vm3, %v2655_v1  ;;  %2228 = vmatprep.subr.mxu1 %v2655_v1 }
  0xc6   :  { %2229 = vmatpush3.msra.mxu1 %v2843_v6 }
  0xc7   :  { %2230 = vmatprep.subr.mxu1 %v2655_v1 }
  0xc8   :  { %2231 = vmatpush3.msra.mxu1 %v2850_v8 }
  0xc9   :  { %2232 = vmatprep.subr.mxu1 %v2655_v1 }
  0xca   :  { %2233 = vmatpush3.msra.mxu1 %v2857_v9 }
  0xcb   :  { %2234 = vmatprep.subr.mxu1 %v2655_v1 }
  0xcc   :  { %2235 = vmatpush3.msra.mxu1 %v2864_v10 }
  0xcd   :  { %2236 = vmatprep.subr.mxu1 %v2655_v1 }
  0xce   :  { %2237 = vmatpush3.msra.mxu1 %v2871_v11 }
  0xcf   :  { %2238 = vmatprep.subr.mxu1 %v2655_v1 }
  0xd0   :  { %2239 = vmatpush3.msra.mxu1 %v2878_v12 }
  0xd1   :  { %2240 = vmatprep.subr.mxu1 %v2655_v1 }
  0xd2   :  { %2241 = vmatpush3.msra.mxu1 %v2885_v13 }
  0xd3   :  { %2242 = vmatprep.subr.mxu1 %v2655_v1 }
  0xd4   :  { %2243 = vmatpush3.msra.mxu1 %v2892_v14 }
  0xd5   :  { %2244 = vmatprep.subr.mxu1 %v2655_v1 }
  0xd6   :  { %2245 = vmatpush3.msra.mxu1 %v2899_v15 }
  0xd7   :  { %2246 = vmatprep.subr.mxu1 %v2655_v1 }
  0xd8   :  { %2247 = vmatpush3.msra.mxu1 %v2906_v16 }
  0xd9   :  { %2248 = vmatprep.subr.mxu1 %v2655_v1 }
  0xda   :  { %2249 = vmatpush3.msra.mxu1 %v2913_v17 }
  0xdb   :  { %2250 = vmatprep.subr.mxu1 %v2655_v1 }
  0xdc   :  { %2251 = vmatpush3.msra.mxu1 %v2930_v39 }
  0xdd   :  { %2306 = vmatprep.subr.mxu1 %v2655_v1 }
 0x109   :  { %v2183_v18 = vpop.f32.mrf.mxu0 }
 0x10b   :  { %v274_v19 = vpop.f32.mrf.mxu0 }
 0x10d   :  { %v2184_v21 = vpop.f32.mrf.mxu0 }
 0x10f   :  { %v277_v23 = vpop.f32.mrf.mxu0 }
 0x17d   :  { %v2195_v20 = vpop.f32.mrf.mxu1 }
 0x17e   :  { %v362_v30 = vadd.f32 %v2195_v20, %v2183_v18 }
 0x17f   :  { %v353_v22 = vpop.f32.mrf.mxu1 }
 0x180   :  { %v354_v35 = vadd.f32 %v353_v22, %v274_v19  ;;  %v2514_v22 = vld [vmem:[%s3254_s2 + $0x30] sm:$0xff]  }
 0x181   :  { %v2196_v24 = vpop.f32.mrf.mxu1 }
 0x182   :  { %v365_v27 = vadd.f32 %v2196_v24, %v2184_v21  ;;  %v2512_v21 = vld [vmem:[%s3254_s2 + $0x38] sm:$0xff]   ;;  %v2518_v24 = vld [vmem:[%s3254_s2 + $0x20] sm:$0xff]  }
 0x183   :  { %v356_v28 = vpop.f32.mrf.mxu1 }
 0x184   :  { %v2207_v25 = vpop.f32.mrf.mxu0  ;;  %v357_v33 = vadd.f32 %v356_v28, %v277_v23  ;;  %v2516_v23 = vld [vmem:[%s3254_s2 + $0x28] sm:$0xff]  }
 0x185   :  { %v460_v34 = vadd.f32 %v2207_v25, %v362_v30 }
 0x186   :  { %v443_v26 = vpop.f32.mrf.mxu0 }
 0x187   :  { %v458_v37 = vadd.f32 %v443_v26, %v354_v35  ;;  %v2513_v35 = vld [vmem:[%s3254_s2 + $0x68] sm:$0xff]  }
 0x188   :  { %v2208_v29 = vpop.f32.mrf.mxu0 }
 0x189   :  { %v461_v31 = vadd.f32 %v2208_v29, %v365_v27  ;;  %v834_v29 = vld [vmem:[%s3255_s3] sm:$0x1] }
 0x18a   :  { %v446_v32 = vpop.f32.mrf.mxu0 }
 0x18b   :  { %2210 = vmatpush3.msra.mxu0 %v461_v31  ;;  %v459_v36 = vadd.f32 %v446_v32, %v357_v33  ;;  %v2510_v32 = vld [vmem:[%s3254_s2 + $0x78] sm:$0xff]   ;;  %v919_v33 = vld [vmem:[#allocation7] sm:$0x1] }
 0x18c   :  { %2211 = vmatprep.subr.mxu0 %v2655_v1 }
 0x18d   :  { %2212 = vmatpush3.msra.mxu0 %v460_v34 }
 0x18e   :  { %2213 = vmatprep.subr.mxu0 %v2655_v1 }
 0x18f   :  { %2214 = vmatpush3.msra.mxu0 %v459_v36 }
 0x190   :  { %2215 = vmatprep.subr.mxu0 %v2655_v1 }
 0x191   :  { %2216 = vmatpush3.msra.mxu0 %v458_v37 }
 0x192   :  { %2218 = vmatmul.mubr.msk.f32.vlgmr.msra.gmra.mxu0 %vm462_vm4, %v2657_v38  ;;  %2255 = vmatprep.subr.mxu0 %v2655_v1 }
 0x193   :  { %2257 = vmatprep.mubr.msk.f32.mxu0 %vm2656_vm3, %v2655_v1  ;;  %2256 = vmatpush3.msra.mxu0 %v2939_v42 }
 0x194   :  { %2260 = vmatprep.subr.mxu0 %v2655_v1 }
 0x252   :  { %v532_v40 = vpop.f32.mrf.mxu0 }
 0x253   :  { %2253 = vmatmul.mubr.f32.vlgmr.msra.gmra.mxu1 %v532_v40  ;;  %v2519_v40 = vld [vmem:[%s3254_s2 + $0x50] sm:$0xff]  }
 0x254   :  { %v2219_v41 = vpop.f32.mrf.mxu0  ;;  %2308 = vmatprep.mubr.msk.f32.mxu1 %vm2656_vm3, %v2655_v1  ;;  %2307 = vmatpush3.msra.mxu1 %v2939_v42 }
 0x255   :  { %2311 = vmatprep.subr.mxu1 %v2655_v1  ;;  %v2520_v41 = vld [vmem:[%s3254_s2 + $0x18] sm:$0xff]  }
 0x313   :  { %v602_v43 = vpop.f32.mrf.mxu1 }
 0x314   :  { %v606_v44 = vmul.f32 0.001953125, %v602_v43  ;;  %v2521_v43 = vld [vmem:[%s3254_s2 + $0x48] sm:$0xff]  }
 0x315   :  { %v2254_v49 = vpop.f32.mrf.mxu1 }
 0x316   :  { %2258 = vmatmul.mubr.msk.f32.vlgmr.msra.gmra.mxu0 %vm607_vm5, %v606_v44  ;;  %v2522_v44 = vld [vmem:[%s3254_s2 + $0x10] sm:$0xff]   ;;  %v2523_v49 = vld [vmem:[%s3254_s2 + $0x40] sm:$0xff]  }
 0x317   :  { %2268 = vmatprep.mubr.msk.f32.mxu0 %vm2656_vm3, %v2655_v1 }
 0x3d6   :  { %v677_v51 = vpop.f32.mrf.mxu0 }
 0x3d7   :  { %v684_v52 = vrot.slane %v677_v51, %v2949_v50  ;;  %v2524_v51 = vld [vmem:[%s3254_s2 + $0x8] sm:$0xff]  }
 0x3d8   :  { %v2259_v53 = vpop.f32.mrf.mxu0 }
 0x3d9   :  { %v2952_v54 = vsub.f32 %v460_v34, %v684_v52  ;;  %v2954_v57 = vsub.f32 %v461_v31, %v684_v52  ;;  %v2956_v58 = vsub.f32 %v459_v36, %v684_v52  ;;  %v2960_v62 = vsub.f32 %v458_v37, %v684_v52  ;;  %v2511_v34 = vld [vmem:[%s3254_s2 + $0x70] sm:$0xff]   ;;  %v2515_v36 = vld [vmem:[%s3254_s2 + $0x60] sm:$0xff]   ;;  %v2517_v37 = vld [vmem:[%s3254_s2 + $0x58] sm:$0xff]  }
 0x3da   :  { %v2525_v52 = vld [vmem:[%s3254_s2 + $0xb8] sm:$0xff]   ;;  %v2526_v53 = vld [vmem:[%s3254_s2] sm:$0xff]  }
 0x3db   :  { %v692_v59 = vmul.f32 %v2954_v57, %v2954_v57  ;;  %v691_v63 = vmul.f32 %v2952_v54, %v2952_v54  ;;  %v690_v0 = vmul.f32 %v2956_v58, %v2956_v58  ;;  %v689_v18 = vmul.f32 %v2960_v62, %v2960_v62 }
 0x3dd   :  { %2261 = vmatpush3.msra.mxu0 %v692_v59 }
 0x3de   :  { %2262 = vmatprep.subr.mxu0 %v2655_v1 }
 0x3df   :  { %2263 = vmatpush3.msra.mxu0 %v691_v63 }
 0x3e0   :  { %2264 = vmatprep.subr.mxu0 %v2655_v1 }
 0x3e1   :  { %2265 = vmatpush3.msra.mxu0 %v690_v0 }
 0x3e2   :  { %2266 = vmatprep.subr.mxu0 %v2655_v1 }
 0x3e3   :  { %2267 = vmatpush3.msra.mxu0 %v689_v18 }
 0x3e4   :  { %2269 = vmatmul.mubr.msk.f32.vlgmr.msra.gmra.mxu0 %vm462_vm4, %v2657_v38  ;;  %2271 = vmatprep.subr.mxu0 %v2655_v1 }
 0x3e5   :  { %2272 = vmatpush3.msra.mxu0 %v2817_v2  ;;  %2303 = vmatprep.mubr.msk.f32.mxu0 %vm2656_vm3, %v2655_v1 }
 0x3e6   :  { %2273 = vmatprep.subr.mxu0 %v2655_v1 }
 0x3e7   :  { %2274 = vmatpush3.msra.mxu0 %v2822_v3 }
 0x3e8   :  { %2275 = vmatprep.subr.mxu0 %v2655_v1 }
 0x3e9   :  { %2276 = vmatpush3.msra.mxu0 %v2829_v4 }
 0x3ea   :  { %2277 = vmatprep.subr.mxu0 %v2655_v1 }
 0x3eb   :  { %2278 = vmatpush3.msra.mxu0 %v2836_v5 }
 0x3ec   :  { %2279 = vmatprep.subr.mxu0 %v2655_v1 }
 0x3ed   :  { %2280 = vmatpush3.msra.mxu0 %v2843_v6 }
 0x3ee   :  { %2281 = vmatprep.subr.mxu0 %v2655_v1 }
 0x3ef   :  { %2282 = vmatpush3.msra.mxu0 %v2850_v8 }
 0x3f0   :  { %2283 = vmatprep.subr.mxu0 %v2655_v1 }
 0x3f1   :  { %2284 = vmatpush3.msra.mxu0 %v2857_v9 }
 0x3f2   :  { %2285 = vmatprep.subr.mxu0 %v2655_v1 }
 0x3f3   :  { %2286 = vmatpush3.msra.mxu0 %v2864_v10 }
 0x3f4   :  { %2287 = vmatprep.subr.mxu0 %v2655_v1 }
 0x3f5   :  { %2288 = vmatpush3.msra.mxu0 %v2871_v11 }
 0x3f6   :  { %2289 = vmatprep.subr.mxu0 %v2655_v1 }
 0x3f7   :  { %2290 = vmatpush3.msra.mxu0 %v2878_v12 }
 0x3f8   :  { %2291 = vmatprep.subr.mxu0 %v2655_v1 }
 0x3f9   :  { %2292 = vmatpush3.msra.mxu0 %v2885_v13 }
 0x3fa   :  { %2293 = vmatprep.subr.mxu0 %v2655_v1 }
 0x3fb   :  { %2294 = vmatpush3.msra.mxu0 %v2892_v14 }
 0x3fc   :  { %2295 = vmatprep.subr.mxu0 %v2655_v1 }
 0x3fd   :  { %2296 = vmatpush3.msra.mxu0 %v2899_v15 }
 0x3fe   :  { %2297 = vmatprep.subr.mxu0 %v2655_v1 }
 0x3ff   :  { %2298 = vmatpush3.msra.mxu0 %v2906_v16 }
 0x400   :  { %2299 = vmatprep.subr.mxu0 %v2655_v1 }
 0x401   :  { %2300 = vmatpush3.msra.mxu0 %v2913_v17 }
 0x402   :  { %2301 = vmatprep.subr.mxu0 %v2655_v1 }
 0x403   :  { %2302 = vmatpush3.msra.mxu0 %v2930_v39 }
 0x404   :  { %2336 = vmatprep.subr.bf16.mxu0 %v2512_v21 }
 0x4a4   :  { %v759_v19 = vpop.f32.mrf.mxu0 }
 0x4a5   :  { %2304 = vmatmul.mubr.f32.vlgmr.msra.gmra.mxu0 %v759_v19 }
 0x4a6   :  { %v2270_v20 = vpop.f32.mrf.mxu0  ;;  %2337 = vmatpush3.bf16.msra.mxu0 %v2512_v21 }
 0x4a7   :  { %2338 = vmatprep.subr.bf16.mxu0 %v2514_v22 }
 0x4aa   :  { %2339 = vmatpush3.bf16.msra.mxu0 %v2514_v22 }
 0x4ab   :  { %2340 = vmatprep.subr.bf16.mxu0 %v2516_v23 }
 0x4ae   :  { %2341 = vmatpush3.bf16.msra.mxu0 %v2516_v23 }
 0x4af   :  { %2342 = vmatprep.subr.bf16.mxu0 %v2518_v24 }
 0x4b2   :  { %2343 = vmatpush3.bf16.msra.mxu0 %v2518_v24 }
 0x4b3   :  { %2344 = vmatprep.subr.bf16.mxu0 %v2520_v41 }
 0x4b6   :  { %2345 = vmatpush3.bf16.msra.mxu0 %v2520_v41 }
 0x4b7   :  { %2346 = vmatprep.subr.bf16.mxu0 %v2522_v44 }
 0x4ba   :  { %2347 = vmatpush3.bf16.msra.mxu0 %v2522_v44 }
 0x4bb   :  { %2348 = vmatprep.subr.bf16.mxu0 %v2524_v51 }
 0x4be   :  { %2349 = vmatpush3.bf16.msra.mxu0 %v2524_v51 }
 0x4bf   :  { %2350 = vmatprep.subr.bf16.mxu0 %v2526_v53 }
 0x4c2   :  { %2351 = vmatpush3.bf16.msra.mxu0 %v2526_v53 }
 0x4c3   :  { %2376 = vmatprep.subr.mxu0 %v2655_v1 }
 0x565   :  { %v829_v25 = vpop.f32.mrf.mxu0 }
 0x566   :  { %v833_v26 = vmul.f32 0.001953125, %v829_v25 }
 0x567   :  { %v2305_v27 = vpop.f32.mrf.mxu0 }
 0x568   :  { %v835_v28 = vadd.f32 1e-05, %v833_v26 }
 0x56a   :  { %2534 = vrsqrt.f32 %v835_v28 }
 0x577   :  { %v2535_v30 = vpop.eup %2534 }
 0x578   :  { %v837_v31 = vmul.f32 %v2535_v30, %v834_v29 }
 0x57a   :  { %2309 = vmatmul.mubr.msk.f32.vlgmr.msra.gmra.mxu1 %vm607_vm5, %v837_v31 }
 0x57b   :  { %2312 = vmatpush3.msra.mxu1 %v2939_v42  ;;  %2313 = vmatprep.mubr.msk.f32.mxu1 %vm2656_vm3, %v2655_v1 }
 0x57c   :  { %2316 = vmatprep.subr.bf16.mxu1 %v2510_v32 }
 0x57e   :  { %2314 = vmatmul.mubr.msk.f32.vlgmr.msra.gmra.mxu1 %vm607_vm5, %v919_v33 }
 0x57f   :  { %2317 = vmatpush3.bf16.msra.mxu1 %v2510_v32 }
 0x580   :  { %2318 = vmatprep.subr.bf16.mxu1 %v2511_v34 }
 0x583   :  { %2319 = vmatpush3.bf16.msra.mxu1 %v2511_v34 }
 0x584   :  { %2320 = vmatprep.subr.bf16.mxu1 %v2513_v35 }
 0x587   :  { %2321 = vmatpush3.bf16.msra.mxu1 %v2513_v35 }
 0x588   :  { %2322 = vmatprep.subr.bf16.mxu1 %v2515_v36 }
 0x58b   :  { %2323 = vmatpush3.bf16.msra.mxu1 %v2515_v36 }
 0x58c   :  { %2324 = vmatprep.subr.bf16.mxu1 %v2517_v37 }
 0x58f   :  { %2325 = vmatpush3.bf16.msra.mxu1 %v2517_v37 }
 0x590   :  { %2326 = vmatprep.subr.bf16.mxu1 %v2519_v40 }
 0x593   :  { %2327 = vmatpush3.bf16.msra.mxu1 %v2519_v40 }
 0x594   :  { %2328 = vmatprep.subr.bf16.mxu1 %v2521_v43 }
 0x597   :  { %2329 = vmatpush3.bf16.msra.mxu1 %v2521_v43 }
 0x598   :  { %2330 = vmatprep.subr.bf16.mxu1 %v2523_v49 }
 0x59b   :  { %2331 = vmatpush3.bf16.msra.mxu1 %v2523_v49 }
 0x59c   :  { %2356 = vmatprep.subr.bf16.mxu1 %v2525_v52 }
 0x63a   :  { %v907_v59 = vpop.f32.mrf.mxu1 }
 0x63b   :  { %v914_v63 = vrot.slane %v907_v59, %v2949_v50 }
 0x63c   :  { %v2310_v0 = vpop.f32.mrf.mxu1 }
 0x63d   :  { %v915_v18 = vmul.f32 %v914_v63, %v2960_v62  ;;  %v916_v20 = vmul.f32 %v914_v63, %v2956_v58  ;;  %v917_v21 = vmul.f32 %v914_v63, %v2952_v54  ;;  %v918_v22 = vmul.f32 %v914_v63, %v2954_v57  ;;  %v2527_v54 = vld [vmem:[%s3254_s2 + $0xb0] sm:$0xff]  }
 0x63e   :  { %v989_v19 = vpop.f32.mrf.mxu1 }
 0x63f   :  { %v996_v23 = vrot.slane %v989_v19, %v2949_v50 }
 0x640   :  { %v2315_v24 = vpop.f32.mrf.mxu1 }
 0x641   :  { %v997_v25 = vadd.f32 %v996_v23, %v915_v18  ;;  %v998_v26 = vadd.f32 %v996_v23, %v916_v20  ;;  %v999_v27 = vadd.f32 %v996_v23, %v917_v21  ;;  %v1000_v28 = vadd.f32 %v996_v23, %v918_v22  ;;  %v2533_v23 = vld [vmem:[%s3254_s2 + $0x80] sm:$0xff]  }
 0x643   :  { %v1003_v29 = vmax.f32 %v999_v27, 0.0  ;;  %v1004_v30 = vmax.f32 %v1000_v28, 0.0  ;;  %v1001_v31 = vmax.f32 %v997_v25, 0.0  ;;  %v1002_v32 = vmax.f32 %v998_v26, 0.0 }
 0x645   :  { %v1007_v33 = vrot.slane %v1003_v29, 7  ;;  %v1047_v62 = vpack.c.bf16 %v1002_v32, %v1001_v31  ;;  %v1048_v34 = vpack.c.bf16 %v1004_v30, %v1003_v29  ;;  %v1005_v58 = vrot.slane %v1001_v31, 7 }
 0x646   :  { %v1006_v57 = vrot.slane %v1002_v32, 7  ;;  %v1008_v35 = vrot.slane %v1004_v30, 7  ;;  %v1017_v36 = vrot.slane %v1001_v31, 1  ;;  %v1018_v37 = vrot.slane %v1002_v32, 1 }
 0x647   :  { %2332 = vmatprep.mubr.bf16.mxu1 %v1047_v62  ;;  %v1019_v40 = vrot.slane %v1003_v29, 1  ;;  %v1020_v22 = vrot.slane %v1004_v30, 1 }
 0x648   :  { %2333 = vmatmul.mubr.bf16.vlgmr.msra.gmra.mxu1 %v1048_v34  ;;  %v1011_v41 = vsel %vm126_vm1, %v1005_v58, %v1006_v57  ;;  %v1012_v43 = vsel %vm126_vm1, %v1008_v35, %v1005_v58  ;;  %v1009_v44 = vsel %vm126_vm1, %v1007_v33, %v1008_v35  ;;  %v1010_v49 = vsel %vm126_vm1, %v1006_v57, %v1007_v33 }
 0x649   :  { %2357 = vmatpush3.bf16.msra.mxu1 %v2525_v52  ;;  %v1013_v51 = vmul.f32 %v1012_v43, %v2782_v46  ;;  %v1014_v53 = vmul.f32 %v1011_v41, %v2786_v48  ;;  %v1022_v59 = vsel %vm159_vm2, %v1018_v37, %v1019_v40  ;;  %v1023_v63 = vsel %vm159_vm2, %v1017_v36, %v1018_v37  ;;  %v2528_v46 = vld [vmem:[%s3254_s2 + $0xa8] sm:$0xff]  }
 0x64a   :  { %2358 = vmatprep.subr.bf16.mxu1 %v2527_v54  ;;  %v1025_v0 = vmul.f32 %v1023_v63, %v2794_v56  ;;  %v1026_v18 = vmul.f32 %v1022_v59, %v2792_v55  ;;  %v1015_v19 = vmul.f32 %v1010_v49, %v2780_v45  ;;  %v1016_v20 = vmul.f32 %v1009_v44, %v2784_v47  ;;  %v2529_v56 = vld [vmem:[%s3254_s2 + $0xa0] sm:$0xff]   ;;  %v2530_v45 = vld [vmem:[%s3254_s2 + $0x98] sm:$0xff]   ;;  %v2531_v47 = vld [vmem:[%s3254_s2 + $0x90] sm:$0xff]  }
 0x64b   :  { %v1029_v52 = vpack.c.bf16 %v1014_v53, %v1013_v51  ;;  %v2532_v55 = vld [vmem:[%s3254_s2 + $0x88] sm:$0xff]   ;;  %v1021_v24 = vsel %vm159_vm2, %v1019_v40, %v1020_v22  ;;  %v1024_v25 = vsel %vm159_vm2, %v1020_v22, %v1017_v36 }
 0x64c   :  { %v1260_v48 = vpack.c.bf16 %v1026_v18, %v1025_v0  ;;  %v1030_v21 = vpack.c.bf16 %v1016_v20, %v1015_v19  ;;  %v1027_v26 = vmul.f32 %v1021_v24, %v2802_v61  ;;  %v1028_v27 = vmul.f32 %v1024_v25, %v2800_v60 }
 0x64d   :  { %2352 = vmatprep.mubr.bf16.mxu0 %v1029_v52  ;;  %2359 = vmatpush3.bf16.msra.mxu1 %v2527_v54 }
 0x64e   :  { %2372 = vmatprep.mubr.bf16.mxu1 %v1260_v48  ;;  %2353 = vmatmul.mubr.bf16.vlgmr.msra.gmra.mxu0 %v1030_v21  ;;  %v1261_v28 = vpack.c.bf16 %v1028_v27, %v1027_v26 }
 0x64f   :  { %2360 = vmatprep.subr.bf16.mxu1 %v2528_v46  ;;  %2384 = vmatprep.mubr.msk.f32.mxu0 %vm2656_vm3, %v2655_v1 }
 0x651   :  { %2361 = vmatpush3.bf16.msra.mxu1 %v2528_v46 }
 0x652   :  { %2362 = vmatprep.subr.bf16.mxu1 %v2529_v56 }
 0x655   :  { %2363 = vmatpush3.bf16.msra.mxu1 %v2529_v56 }
 0x656   :  { %2364 = vmatprep.subr.bf16.mxu1 %v2530_v45 }
 0x659   :  { %2365 = vmatpush3.bf16.msra.mxu1 %v2530_v45 }
 0x65a   :  { %2366 = vmatprep.subr.bf16.mxu1 %v2531_v47 }
 0x65d   :  { %2367 = vmatpush3.bf16.msra.mxu1 %v2531_v47 }
 0x65e   :  { %2368 = vmatprep.subr.bf16.mxu1 %v2532_v55 }
 0x661   :  { %2369 = vmatpush3.bf16.msra.mxu1 %v2532_v55 }
 0x662   :  { %2370 = vmatprep.subr.bf16.mxu1 %v2533_v23 }
 0x665   :  { %2371 = vmatpush3.bf16.msra.mxu1 %v2533_v23 }
 0x666   :  { %2422 = vmatprep.subr.mxu1 %v2655_v1 }
 0x668   :  { %2373 = vmatmul.mubr.bf16.vlgmr.msra.gmra.mxu1 %v1261_v28 }
 0x669   :  { %2423 = vmatpush3.msra.mxu1 %v2939_v42  ;;  %2424 = vmatprep.mubr.msk.f32.mxu1 %vm2656_vm3, %v2655_v1 }
 0x66a   :  { %2427 = vmatprep.subr.mxu1 %v2655_v1 }
 0x708   :  { %v2334_v7 = vpop.f32.mrf.mxu1 }
 0x70a   :  { %v1148_v29 = vpop.f32.mrf.mxu1 }
 0x70c   :  { %v2335_v31 = vpop.f32.mrf.mxu1 }
 0x70e   :  { %v2354_v30 = vpop.f32.mrf.mxu0  ;;  %v1151_v61 = vpop.f32.mrf.mxu1 }
 0x70f   :  { %v1254_v57 = vadd.f32 %v2354_v30, %v2334_v7 }
 0x710   :  { %v1245_v32 = vpop.f32.mrf.mxu0 }
 0x711   :  { %v1246_v41 = vadd.f32 %v1245_v32, %v1148_v29 }
 0x712   :  { %v2355_v33 = vpop.f32.mrf.mxu0 }
 0x713   :  { %v1257_v34 = vadd.f32 %v2355_v33, %v2335_v31 }
 0x714   :  { %v1248_v54 = vpop.f32.mrf.mxu0 }
 0x715   :  { %v1249_v37 = vadd.f32 %v1248_v54, %v1151_v61 }
 0x728   :  { %v2374_v60 = vpop.f32.mrf.mxu1 }
 0x729   :  { %v1378_v40 = vadd.f32 %v2374_v60, %v1254_v57 }
 0x72a   :  { %v1361_v62 = vpop.f32.mrf.mxu1 }
 0x72b   :  { %v1376_v44 = vadd.f32 %v1361_v62, %v1246_v41 }
 0x72c   :  { %v2375_v58 = vpop.f32.mrf.mxu1 }
 0x72d   :  { %v3125_v35 = vadd.f32 %v2375_v58, %v1257_v34 }
 0x72e   :  { %v1364_v36 = vpop.f32.mrf.mxu1 }
 0x72f   :  { %2377 = vmatpush3.msra.mxu0 %v3125_v35  ;;  %v1377_v43 = vadd.f32 %v1364_v36, %v1249_v37 }
 0x730   :  { %2378 = vmatprep.subr.mxu0 %v2655_v1 }
 0x731   :  { %2379 = vmatpush3.msra.mxu0 %v1378_v40 }
 0x732   :  { %2380 = vmatprep.subr.mxu0 %v2655_v1 }
 0x733   :  { %2381 = vmatpush3.msra.mxu0 %v1377_v43 }
 0x734   :  { %2382 = vmatprep.subr.mxu0 %v2655_v1 }
 0x735   :  { %2383 = vmatpush3.msra.mxu0 %v1376_v44 }
 0x736   :  { %2385 = vmatmul.mubr.msk.f32.vlgmr.msra.gmra.mxu0 %vm462_vm4, %v2657_v38  ;;  %2387 = vmatprep.subr.mxu0 %v2655_v1 }
 0x737   :  { %2388 = vmatpush3.msra.mxu0 %v2817_v2  ;;  %2419 = vmatprep.mubr.msk.f32.mxu0 %vm2656_vm3, %v2655_v1 }
 0x738   :  { %2389 = vmatprep.subr.mxu0 %v2655_v1 }
 0x739   :  { %2390 = vmatpush3.msra.mxu0 %v2822_v3 }
 0x73a   :  { %2391 = vmatprep.subr.mxu0 %v2655_v1 }
 0x73b   :  { %2392 = vmatpush3.msra.mxu0 %v2829_v4 }
 0x73c   :  { %2393 = vmatprep.subr.mxu0 %v2655_v1 }
 0x73d   :  { %2394 = vmatpush3.msra.mxu0 %v2836_v5 }
 0x73e   :  { %2395 = vmatprep.subr.mxu0 %v2655_v1 }
 0x73f   :  { %2396 = vmatpush3.msra.mxu0 %v2843_v6 }
 0x740   :  { %2397 = vmatprep.subr.mxu0 %v2655_v1 }
 0x741   :  { %2398 = vmatpush3.msra.mxu0 %v2850_v8 }
 0x742   :  { %2399 = vmatprep.subr.mxu0 %v2655_v1 }
 0x743   :  { %2400 = vmatpush3.msra.mxu0 %v2857_v9 }
 0x744   :  { %2401 = vmatprep.subr.mxu0 %v2655_v1 }
 0x745   :  { %2402 = vmatpush3.msra.mxu0 %v2864_v10 }
 0x746   :  { %2403 = vmatprep.subr.mxu0 %v2655_v1 }
 0x747   :  { %2404 = vmatpush3.msra.mxu0 %v2871_v11 }
 0x748   :  { %2405 = vmatprep.subr.mxu0 %v2655_v1 }
 0x749   :  { %2406 = vmatpush3.msra.mxu0 %v2878_v12 }
 0x74a   :  { %2407 = vmatprep.subr.mxu0 %v2655_v1 }
 0x74b   :  { %2408 = vmatpush3.msra.mxu0 %v2885_v13 }
 0x74c   :  { %2409 = vmatprep.subr.mxu0 %v2655_v1 }
 0x74d   :  { %2410 = vmatpush3.msra.mxu0 %v2892_v14 }
 0x74e   :  { %2411 = vmatprep.subr.mxu0 %v2655_v1 }
 0x74f   :  { %2412 = vmatpush3.msra.mxu0 %v2899_v15 }
 0x750   :  { %2413 = vmatprep.subr.mxu0 %v2655_v1 }
 0x751   :  { %2414 = vmatpush3.msra.mxu0 %v2906_v16 }
 0x752   :  { %2415 = vmatprep.subr.mxu0 %v2655_v1 }
 0x753   :  { %2416 = vmatpush3.msra.mxu0 %v2913_v17 }
 0x754   :  { %2417 = vmatprep.subr.mxu0 %v2655_v1 }
 0x755   :  { %2418 = vmatpush3.msra.mxu0 %v2930_v39 }
 0x756   :  { %2473 = vmatprep.subr.mxu0 %v2655_v1 }
 0x7f6   :  { %v1446_v49 = vpop.f32.mrf.mxu0 }
 0x7f7   :  { %2420 = vmatmul.mubr.f32.vlgmr.msra.gmra.mxu0 %v1446_v49 }
 0x7f8   :  { %v2386_v51 = vpop.f32.mrf.mxu0  ;;  %2474 = vmatpush3.msra.mxu0 %v2939_v42  ;;  %2475 = vmatprep.mubr.msk.f32.mxu0 %vm2656_vm3, %v2655_v1 }
 0x7f9   :  { %2478 = vmatprep.subr.mxu0 %v2655_v1 }
 0x8b7   :  { %v1516_v53 = vpop.f32.mrf.mxu0 }
 0x8b8   :  { %v1520_v59 = vmul.f32 0.001953125, %v1516_v53 }
 0x8b9   :  { %v2421_v63 = vpop.f32.mrf.mxu0 }
 0x8ba   :  { %2425 = vmatmul.mubr.msk.f32.vlgmr.msra.gmra.mxu1 %vm607_vm5, %v1520_v59 }
 0x8bb   :  { %2435 = vmatprep.mubr.msk.f32.mxu1 %vm2656_vm3, %v2655_v1 }
 0x97a   :  { %v1590_v0 = vpop.f32.mrf.mxu1 }
 0x97b   :  { %v1597_v18 = vrot.slane %v1590_v0, %v2949_v50 }
 0x97c   :  { %v2426_v19 = vpop.f32.mrf.mxu1 }
 0x97d   :  { %v3176_v20 = vsub.f32 %v1378_v40, %v1597_v18  ;;  %v3179_v52 = vsub.f32 %v3125_v35, %v1597_v18  ;;  %v3181_v46 = vsub.f32 %v1377_v43, %v1597_v18  ;;  %v3185_v21 = vsub.f32 %v1376_v44, %v1597_v18 }
 0x97f   :  { %v1605_v48 = vmul.f32 %v3179_v52, %v3179_v52  ;;  %v1604_v56 = vmul.f32 %v3176_v20, %v3176_v20  ;;  %v1603_v45 = vmul.f32 %v3181_v46, %v3181_v46  ;;  %v1602_v47 = vmul.f32 %v3185_v21, %v3185_v21 }
 0x981   :  { %2428 = vmatpush3.msra.mxu1 %v1605_v48 }
 0x982   :  { %2429 = vmatprep.subr.mxu1 %v2655_v1 }
 0x983   :  { %2430 = vmatpush3.msra.mxu1 %v1604_v56 }
 0x984   :  { %2431 = vmatprep.subr.mxu1 %v2655_v1 }
 0x985   :  { %2432 = vmatpush3.msra.mxu1 %v1603_v45 }
 0x986   :  { %2433 = vmatprep.subr.mxu1 %v2655_v1 }
 0x987   :  { %2434 = vmatpush3.msra.mxu1 %v1602_v47 }
 0x988   :  { %2436 = vmatmul.mubr.msk.f32.vlgmr.msra.gmra.mxu1 %vm462_vm4, %v2657_v38  ;;  %2438 = vmatprep.subr.mxu1 %v2655_v1 }
 0x989   :  { %2439 = vmatpush3.msra.mxu1 %v2817_v2  ;;  %2470 = vmatprep.mubr.msk.f32.mxu1 %vm2656_vm3, %v2655_v1 }
 0x98a   :  { %2440 = vmatprep.subr.mxu1 %v2655_v1 }
 0x98b   :  { %2441 = vmatpush3.msra.mxu1 %v2822_v3 }
 0x98c   :  { %2442 = vmatprep.subr.mxu1 %v2655_v1 }
 0x98d   :  { %2443 = vmatpush3.msra.mxu1 %v2829_v4 }
 0x98e   :  { %2444 = vmatprep.subr.mxu1 %v2655_v1 }
 0x98f   :  { %2445 = vmatpush3.msra.mxu1 %v2836_v5 }
 0x990   :  { %2446 = vmatprep.subr.mxu1 %v2655_v1 }
 0x991   :  { %2447 = vmatpush3.msra.mxu1 %v2843_v6 }
 0x992   :  { %2448 = vmatprep.subr.mxu1 %v2655_v1 }
 0x993   :  { %2449 = vmatpush3.msra.mxu1 %v2850_v8 }
 0x994   :  { %2450 = vmatprep.subr.mxu1 %v2655_v1 }
 0x995   :  { %2451 = vmatpush3.msra.mxu1 %v2857_v9  ;;  %v1747_v9 = vld [vmem:[#allocation8] sm:$0x1] }
 0x996   :  { %2452 = vmatprep.subr.mxu1 %v2655_v1 }
 0x997   :  { %2453 = vmatpush3.msra.mxu1 %v2864_v10 }
 0x998   :  { %2454 = vmatprep.subr.mxu1 %v2655_v1 }
 0x999   :  { %2455 = vmatpush3.msra.mxu1 %v2871_v11 }
 0x99a   :  { %2456 = vmatprep.subr.mxu1 %v2655_v1 }
 0x99b   :  { %2457 = vmatpush3.msra.mxu1 %v2878_v12  ;;  %v1832_v12 = vld [vmem:[%s3258_s6] sm:$0x1]  ;;  %s1927_s6 = sshll.u32 %s2658_s24, 4  ;;  %s1928_s6 = int_to_ptr.vmem [resolvable:$true] %s1927_s6 }
 0x99c   :  { %2458 = vmatprep.subr.mxu1 %v2655_v1  ;;  %s2618_s7 = scalar_lea.vmem %s1928_s6, 512  ;;  %p2623_p7 = scmp.lt.s32.totalorder %s1928_s6, %s1928_s6 }
 0x99d   :  { %2459 = vmatpush3.msra.mxu1 %v2885_v13  ;;  %p2619_p6 = scmp.ne.s32.totalorder %s1928_s6, %s2618_s7  ;;  %p2624_p8 = scmp.lt.s32.totalorder %s2618_s7, %s2618_s7 }
 0x99e   :  { %2460 = vmatprep.subr.mxu1 %v2655_v1 }
 0x99f   :  { %2461 = vmatpush3.msra.mxu1 %v2892_v14  ;;  %p2625_p9 = por %p2624_p8, %p2623_p7 }
 0x9a0   :  { %2462 = vmatprep.subr.mxu1 %v2655_v1 }
 0x9a1   :  { %2463 = vmatpush3.msra.mxu1 %v2899_v15  ;;  %p2626_p10 = pnand %p2625_p9, %p2619_p6 }
 0x9a2   :  { %2464 = vmatprep.subr.mxu1 %v2655_v1 }
 0x9a3   :  { %2465 = vmatpush3.msra.mxu1 %v2906_v16 }
 0x9a4   :  { %2466 = vmatprep.subr.mxu1 %v2655_v1 }
 0x9a5   :  { %2467 = vmatpush3.msra.mxu1 %v2913_v17 }
 0x9a6   :  { %2468 = vmatprep.subr.mxu1 %v2655_v1 }
 0x9a7   :  { %2469 = vmatpush3.msra.mxu1 %v2930_v39 }
 0xa48   :  { %v1672_v2 = vpop.f32.mrf.mxu1 }
 0xa49   :  { %2471 = vmatmul.mubr.f32.vlgmr.msra.gmra.mxu1 %v1672_v2 }
 0xa4a   :  { %v2437_v3 = vpop.f32.mrf.mxu1 }
 0xb09   :  { %v1742_v4 = vpop.f32.mrf.mxu1 }
 0xb0a   :  { %v1746_v5 = vmul.f32 0.001953125, %v1742_v4 }
 0xb0b   :  { %v2472_v6 = vpop.f32.mrf.mxu1 }
 0xb0c   :  { %v1748_v8 = vadd.f32 1e-05, %v1746_v5 }
 0xb0e   :  { %2536 = vrsqrt.f32 %v1748_v8 }
 0xb1b   :  { %v2537_v10 = vpop.eup %2536 }
 0xb1c   :  { %v1750_v11 = vmul.f32 %v2537_v10, %v1747_v9 }
 0xb1e   :  { %2476 = vmatmul.mubr.msk.f32.vlgmr.msra.gmra.mxu0 %vm607_vm5, %v1750_v11 }
 0xb1f   :  { %2479 = vmatpush3.msra.mxu0 %v2939_v42  ;;  %2480 = vmatprep.mubr.msk.f32.mxu0 %vm2656_vm3, %v2655_v1 }
 0xb22   :  { %2481 = vmatmul.mubr.msk.f32.vlgmr.msra.gmra.mxu0 %vm607_vm5, %v1832_v12 }
 0xbde   :  { %v1820_v13 = vpop.f32.mrf.mxu0 }
 0xbdf   :  { %v1827_v14 = vrot.slane %v1820_v13, %v2949_v50 }
 0xbe0   :  { %v2477_v15 = vpop.f32.mrf.mxu0 }
 0xbe1   :  { %v1828_v16 = vmul.f32 %v1827_v14, %v3185_v21  ;;  %v1829_v38 = vmul.f32 %v1827_v14, %v3181_v46  ;;  %v1830_v39 = vmul.f32 %v1827_v14, %v3176_v20  ;;  %v1831_v42 = vmul.f32 %v1827_v14, %v3179_v52 }
 0xbe2   :  { %v1902_v17 = vpop.f32.mrf.mxu0 }
 0xbe3   :  { %v1909_v1 = vrot.slane %v1902_v17, %v2949_v50 }
 0xbe4   :  { %v2482_v55 = vpop.f32.mrf.mxu0 }
 0xbe5   :  { %v1910_v22 = vadd.f32 %v1909_v1, %v1828_v16  ;;  %v1911_v23 = vadd.f32 %v1909_v1, %v1829_v38  ;;  %v1912_v24 = vadd.f32 %v1909_v1, %v1830_v39  ;;  %v1913_v25 = vadd.f32 %v1909_v1, %v1831_v42 }
 0xbe7   :  { %v1914_v26 = vmax.f32 %v1910_v22, 0.0  ;;  %v1915_v27 = vmax.f32 %v1911_v23, 0.0  ;;  %v1916_v28 = vmax.f32 %v1912_v24, 0.0  ;;  %v1917_v7 = vmax.f32 %v1913_v25, 0.0 }
 0xbe9   :  { %1918 = vst [vmem:[#allocation10] sm:$0xff] %v1914_v26  ;;  %1919 = vst [vmem:[#allocation10 + $0x8] sm:$0xff] %v1915_v27 }
 0xbea   :  { %1920 = vst [vmem:[#allocation10 + $0x10] sm:$0xff] %v1916_v28  ;;  %1921 = vst [vmem:[#allocation10 + $0x18] sm:$0xff] %v1917_v7 }
 0xbeb   :  { %2629 = shalt.err (!%p2626_p10)
}
 0xbec   :  { %1933 = dma.vmem_to_hbm [thread:$0]  %s1928_s6, 512, %s3263_s11, [#allocation4], %s2650_s27, %s2650_s27, %s2651_s28  }
 0xbed   :  { %2644 = dma.done.wait [#allocation4], 512  }
 0xbee   :  { %2645 = vsyncadd [#allocation4], 4294966784 }
 0xbef   :  { %1937 = vsyncpa [#allocation3], 1 }
 0xbf0   :  { %1938 = vsyncpa [#allocation6], 1 }
 0xbf1   :  { %1939 = vsyncpa [#allocation9], 1 }
 0xbf2   :  { %1940 = vsyncpa [#allocation4], 1 }

</bundles_post_ra>
